<compile_context>
chip_gen: v7x
topology: tpu7x:2x2x1
jax: 0.10.0
libtpu: 0.0.40
codegen_flags: <defaults>
</compile_context>

<pallas_src>
import functools

import jax
import jax.numpy as jnp
from jax.experimental import pallas as pl
from jax.experimental.pallas import tpu as pltpu


# ---------------------------------------------------------------------------
# pltpu.roll direction probe (one tiny pallas_call, cached at first use).
# We only need "rotate by s in a fixed direction"; the probe pins the sign so
# the rel-shift below is independent of the underlying rotate convention.
# ---------------------------------------------------------------------------
_ROLL_NUMPY_LIKE = None


def _probe_roll_direction():
    def kern(x_ref, o_ref):
        o_ref[...] = pltpu.roll(x_ref[...], shift=1, axis=1)

    x = jnp.tile(jax.lax.iota(jnp.float32, 128)[None, :], (8, 1))
    y = pl.pallas_call(
        kern, out_shape=jax.ShapeDtypeStruct((8, 128), jnp.float32))(x)
    # jnp.roll semantics: roll([0..127], 1)[0] == 127
    return bool(jax.device_get(y)[0, 0] == 127.0)


def _ensure_roll_direction():
    global _ROLL_NUMPY_LIKE
    if _ROLL_NUMPY_LIKE is None:
        _ROLL_NUMPY_LIKE = _probe_roll_direction()
    return _ROLL_NUMPY_LIKE


def _roll_right(x, s, axis):
    """out[..., j] = x[..., (j - s) % n] along `axis` (in-vreg XLU rotate)."""
    n = x.shape[axis]
    s = s % n
    if s == 0:
        return x
    if not _ROLL_NUMPY_LIKE:
        s = n - s
    return pltpu.roll(x, shift=s, axis=axis)


# ---------------------------------------------------------------------------
# In-kernel helpers
# ---------------------------------------------------------------------------
def _layer_norm(v, gamma, beta, eps=1e-5):
    mu = jnp.mean(v, axis=-1, keepdims=True)
    var = jnp.mean((v - mu) ** 2, axis=-1, keepdims=True)
    return (v - mu) * jax.lax.rsqrt(var + eps) * gamma + beta


def _rel_shift_masks(t, k):
    """Row/col masks for the rel-shift, hoisted so every head reuses them."""
    row = jax.lax.broadcasted_iota(jnp.int32, (t, k), 0)
    col = jax.lax.broadcasted_iota(jnp.int32, (t, k), 1)
    rel = col - row
    stage_masks = tuple(
        (1 << b, (row & (1 << b)) != 0) for b in range((t - 1).bit_length()))
    return stage_masks, rel <= 0, rel == 1


def _rel_shift_2d(m, stage_masks, sel_le0, sel_eq1):
    """Exact Transformer-XL `_rel_shift` of one (qlen, klen) tile, qlen == klen.

    Closed form of pad-one-zero-column / flatten / drop / reshape:
        out[i,j] = m[i,   (j-(i+1)) % K]   if j - i <= 0
                 = 0                       if j - i == 1
                 = m[i+1, (j-(i+2)) % K]   if j - i >= 2
    The row-dependent rotation is a log2(T)-stage conditional rotate built on
    pltpu.roll: rotations stay in vregs on the XLU slot (no VMEM scratch, no
    gathers, no lane reshapes).
    """
    t, _ = m.shape
    rot = m
    for s, msk in stage_masks:                       # right-rotate row i by i
        rot = jnp.where(msk, _roll_right(rot, s, axis=1), rot)
    s_a = _roll_right(rot, 1, axis=1)                # m[i,   (j-(i+1)) % K]
    s_c = _roll_right(s_a, t - 1, axis=0)            # s_a[i+1, :] (wrap masked)
    return jnp.where(sel_le0, s_a,
                     jnp.where(sel_eq1, jnp.zeros_like(s_a), s_c))


# ---------------------------------------------------------------------------
# Fused encoder layer kernel: one program per batch element
# ---------------------------------------------------------------------------
def _encoder_layer_kernel(x_ref, wqkv_ref, rwb_ref, remb_ref, rbias_ref, wo_ref,
                          g1_ref, be1_ref, w1_ref, b1_ref, w2_ref, b2_ref,
                          g2_ref, be2_ref, out_ref,
                          *, n_head, d_head, compute_dtype, approx_recip):
    H, Dh = n_head, d_head
    cd = compute_dtype
    scale = 1.0 / (d_head ** 0.5)
    x = x_ref[0]                                                   # (T, D) f32
    T, D = x.shape

    # ---- fused QKV projection: ONE (T, D) @ (D, 3*H*Dh) MXU matmul ---------
    # D-deep contraction, 3*H*Dh lane-dense output; per-head q/k/v are value
    # slices of the result (no head-split scratch, no masked slab stores).
    qkv = jnp.dot(x.astype(cd), wqkv_ref[...],
                  preferred_element_type=jnp.float32)              # (T, 3HDh)

    # Rel-shift masks computed once, shared by all heads.
    stage_masks, sel_le0, sel_eq1 = _rel_shift_masks(T, T)

    t_bt = (((1,), (1,)), ((), ()))                # contract last dims: A @ B^T

    # ---- per-head attention, fully fused (single live (T,T) score tile) ----
    attn = jnp.zeros((T, D), jnp.float32)
    for h in range(H):
        q_h = qkv[:, h * Dh:(h + 1) * Dh]                          # (T, Dh)
        k_h = qkv[:, (H + h) * Dh:(H + h + 1) * Dh]
        v_h = qkv[:, (2 * H + h) * Dh:(2 * H + h + 1) * Dh]

        # AC[i,j] = (q_i + r_w_bias) . k_j ; B_[i,j] = q_i . r_emb_j
        ac = jax.lax.dot_general((q_h + rwb_ref[h]).astype(cd), k_h.astype(cd),
                                 t_bt, preferred_element_type=jnp.float32)
        b_ = jax.lax.dot_general(q_h.astype(cd), remb_ref[h],
                                 t_bt, preferred_element_type=jnp.float32)
        s = _rel_shift_2d(b_ + rbias_ref[h], stage_masks, sel_le0, sel_eq1)
        s = (ac + s) * scale

        # softmax over klen (f32; denominator reciprocal on the EUP)
        s = s - jnp.max(s, axis=-1, keepdims=True)
        p = jnp.exp(s)
        prob = p * pl.reciprocal(jnp.sum(p, axis=-1, keepdims=True),
                                 approx=approx_recip)

        av = jnp.dot(prob.astype(cd), v_h.astype(cd),
                     preferred_element_type=jnp.float32)           # (T, Dh)
        # O-projection folded into the head loop: attn = sum_h av_h @ Wo_h
        attn = attn + jnp.dot(av.astype(cd), wo_ref[h],
                              preferred_element_type=jnp.float32)  # (T, D)

    # ---- residual + post-LN, PositionwiseFF, residual + post-LN ------------
    # (dropout / dropatt are identity in eval mode)
    y = _layer_norm(x + attn, g1_ref[0], be1_ref[0])
    h1 = jnp.maximum(
        jnp.dot(y.astype(cd), w1_ref[...],
                preferred_element_type=jnp.float32) + b1_ref[0], 0.0)
    ff = jnp.dot(h1.astype(cd), w2_ref[...],
                 preferred_element_type=jnp.float32) + b2_ref[0]
    out_ref[0] = _layer_norm(y + ff, g2_ref[0], be2_ref[0])


# ---------------------------------------------------------------------------
# Wrappers
# ---------------------------------------------------------------------------
def _pick_vmem_limit():
    # v5e/v6e: 128 MiB physical VMEM per TensorCore, v7x: 64 MiB.  Never request
    # the whole chip; leave headroom for double-buffered I/O + compiler scratch.
    try:
        cap = int(pltpu.get_tpu_info().vmem_capacity_bytes)
    except Exception:
        cap = 64 * 1024 * 1024                 # conservative (v7x-sized) fallback
    return max(16 * 1024 * 1024, min(64 * 1024 * 1024, (cap * 3) // 4))


def rel_learnable_layer(x_btd, p, *, n_head, d_head,
                        compute_dtype=jnp.bfloat16, approx_recip=True):
    """One BaseEncoder layer (RelLearnableMultiHeadAttn + PositionwiseFF)."""
    _ensure_roll_direction()
    B, T, D = x_btd.shape
    H, Dh = n_head, d_head
    K = T                                   # klen == qlen (mems is None)
    d_inner = p["w1"].shape[1]

    k_len = p["r_emb"].shape[0]
    assert K <= k_len, "klen > k_len padding branch not needed at these shapes"
    # TODO(synk): the klen > r_emb.size(0) zero-padding branch of the reference
    # is unreachable here (k_len = d_model >= seq len) and is not implemented.

    r_emb = jnp.transpose(p["r_emb"][-K:], (1, 0, 2)).astype(compute_dtype)   # (H, K, Dh)
    r_bias = jnp.transpose(p["r_bias"][-K:], (1, 0))[:, None, :]              # (H, 1, K)
    r_w_bias = p["r_w_bias"][:, None, :]                                      # (H, 1, Dh)

    def heads_to_cols(w):                   # (H, D, Dh) -> (D, H*Dh)
        return jnp.transpose(w, (1, 0, 2)).reshape(D, H * Dh)

    w_qkv = jnp.concatenate(
        [heads_to_cols(p["wq"]), heads_to_cols(p["wk"]), heads_to_cols(p["wv"])],
        axis=1).astype(compute_dtype)                                         # (D, 3*H*Dh)
    w_o = p["wo"].astype(compute_dtype)                                       # (H, Dh, D)

    kernel = functools.partial(_encoder_layer_kernel, n_head=H, d_head=Dh,
                               compute_dtype=compute_dtype,
                               approx_recip=approx_recip)
    # TODO(synk): at realistic T, add a q-tile "parallel" grid axis with an
    # online softmax, and single-buffer the constant-index weight slabs
    # (pipeline_mode=pl.Buffered(1) or manual DMA from pl.ANY).
    return pl.pallas_call(
        kernel,
        out_shape=jax.ShapeDtypeStruct((B, T, D), jnp.float32),
        grid=(B,),
        in_specs=[
            pl.BlockSpec((1, T, D), lambda b: (b, 0, 0)),        # x (batch-major)
            pl.BlockSpec((D, 3 * H * Dh), lambda b: (0, 0)),     # fused W_qkv
            pl.BlockSpec((H, 1, Dh), lambda b: (0, 0, 0)),       # r_w_bias
            pl.BlockSpec((H, K, Dh), lambda b: (0, 0, 0)),       # r_emb
            pl.BlockSpec((H, 1, K), lambda b: (0, 0, 0)),        # r_bias
            pl.BlockSpec((H, Dh, D), lambda b: (0, 0, 0)),       # W_o (per-head slabs)
            pl.BlockSpec((1, D), lambda b: (0, 0)),              # LN1 gamma
            pl.BlockSpec((1, D), lambda b: (0, 0)),              # LN1 beta
            pl.BlockSpec((D, d_inner), lambda b: (0, 0)),        # FF W1
            pl.BlockSpec((1, d_inner), lambda b: (0, 0)),        # FF b1
            pl.BlockSpec((d_inner, D), lambda b: (0, 0)),        # FF W2
            pl.BlockSpec((1, D), lambda b: (0, 0)),              # FF b2
            pl.BlockSpec((1, D), lambda b: (0, 0)),              # LN2 gamma
            pl.BlockSpec((1, D), lambda b: (0, 0)),              # LN2 beta
        ],
        out_specs=pl.BlockSpec((1, T, D), lambda b: (b, 0, 0)),
        compiler_params=pltpu.CompilerParams(
            dimension_semantics=("parallel",),          # megacore / 2-TC sharding
            vmem_limit_bytes=_pick_vmem_limit()),
    )(x_btd, w_qkv, r_w_bias, r_emb, r_bias, w_o,
      p["ln1_g"], p["ln1_b"],
      p["w1"].astype(compute_dtype), p["b1"],
      p["w2"].astype(compute_dtype), p["b2"],
      p["ln2_g"], p["ln2_b"])


def build_encoder_forward(inputs, input_lengths, layer_params, *, n_head, d_head,
                          compute_dtype=jnp.bfloat16, approx_recip=True):
    """BuildEncoder.forward: inputs (T, B, d_model) -> (T, B, d_model)."""
    assert inputs.ndim == 3
    del input_lengths   # the reference forward never builds a mask from it
    x_btd = jnp.transpose(inputs, (1, 0, 2)).astype(jnp.float32)
    # The reference BuildEncoder loop is `for layer: x = layer(inputs, ...)`,
    # i.e. every layer sees the ORIGINAL inputs and only the last x is returned,
    # so evaluating just the final layer is bit-identical and n_layer-x faster.
    out = rel_learnable_layer(x_btd, layer_params[-1], n_head=n_head,
                              d_head=d_head, compute_dtype=compute_dtype,
                              approx_recip=approx_recip)
    return jnp.transpose(out, (1, 0, 2))


# ---------------------------------------------------------------------------
# Tiny Pallas harness to validate the in-kernel rel-shift exactly
# ---------------------------------------------------------------------------
def _rel_shift_test_kernel(m_ref, o_ref):
    t, k = m_ref.shape
    stage_masks, sel_le0, sel_eq1 = _rel_shift_masks(t, k)
    o_ref[...] = _rel_shift_2d(m_ref[...], stage_masks, sel_le0, sel_eq1)


def rel_shift_pallas(m):
    _ensure_roll_direction()
    t, k = m.shape
    return pl.pallas_call(
        _rel_shift_test_kernel,
        out_shape=jax.ShapeDtypeStruct((t, k), m.dtype),
    )(m)


# ---------------------------------------------------------------------------
# Pure-JAX reference (mirrors the PyTorch module, f32, HIGHEST precision)
# ---------------------------------------------------------------------------
def _rel_shift_ref(x):
    """Reference Transformer-XL _rel_shift on the trailing (qlen, klen) dims."""
    *lead, q, k = x.shape
    zero_pad = jnp.zeros((*lead, q, 1), x.dtype)
    xp = jnp.concatenate([zero_pad, x], axis=-1).reshape(*lead, q * (k + 1))
    return xp[..., q:].reshape(*lead, q, k)


def _layer_reference(x_btd, p, *, n_head, d_head):
    B, T, D = x_btd.shape
    H, Dh = n_head, d_head
    K = T
    hp = jax.lax.Precision.HIGHEST
    scale = 1.0 / (Dh ** 0.5)
    r_emb = p["r_emb"][-K:]                     # (K, H, Dh)
    r_bias = p["r_bias"][-K:]                   # (K, H)
    q = jnp.einsum('btd,hde->bhte', x_btd, p["wq"], precision=hp)
    k = jnp.einsum('btd,hde->bhte', x_btd, p["wk"], precision=hp)
    v = jnp.einsum('btd,hde->bhte', x_btd, p["wv"], precision=hp)
    ac = jnp.einsum('bhte,bhse->bhts',
                    q + p["r_w_bias"][None, :, None, :], k, precision=hp)
    b_ = jnp.einsum('bhte,she->bhts', q, r_emb, precision=hp)
    d_ = jnp.transpose(r_bias)[None, :, None, :]
    bd = _rel_shift_ref(b_ + d_)
    prob = jax.nn.softmax((ac + bd) * scale, axis=-1)
    av = jnp.einsum('bhts,bhse->bhte', prob, v, precision=hp)
    av_flat = jnp.transpose(av, (0, 2, 1, 3)).reshape(B, T, H * Dh)
    attn_out = jnp.einsum('btk,kd->btd', av_flat, p["wo"].reshape(H * Dh, D),
                          precision=hp)
    y = _layer_norm(x_btd + attn_out, p["ln1_g"][0], p["ln1_b"][0])
    h1 = jnp.maximum(
        jnp.einsum('btd,df->btf', y, p["w1"], precision=hp) + p["b1"][0], 0.0)
    ff = jnp.einsum('btf,fd->btd', h1, p["w2"], precision=hp) + p["b2"][0]
    return _layer_norm(y + ff, p["ln2_g"][0], p["ln2_b"][0])


# ---------------------------------------------------------------------------
# Deterministic parameter init (synthetic; no checkpoint loading)
# ---------------------------------------------------------------------------
def init_layer_params(key, *, k_len, n_head, d_model, d_head, d_inner):
    ks = jax.random.split(key, 15)

    def nrm(k, shape, s):
        return s * jax.random.normal(k, shape, jnp.float32)

    return dict(
        # qkv_net (Linear(d_model, 3*H*Dh, bias=False)) as per-head slabs
        wq=nrm(ks[0], (n_head, d_model, d_head), 0.09),
        wk=nrm(ks[1], (n_head, d_model, d_head), 0.09),
        wv=nrm(ks[2], (n_head, d_model, d_head), 0.09),
        # o_net (Linear(H*Dh, d_model, bias=False)) as per-head (Dh, D) slabs
        wo=nrm(ks[3], (n_head, d_head, d_model), 0.09),
        # BaseEncoder relative-position parameters
        r_emb=nrm(ks[4], (k_len, n_head, d_head), 0.3),
        r_w_bias=nrm(ks[5], (n_head, d_head), 0.3),
        r_bias=nrm(ks[6], (k_len, n_head), 0.3),
        # attention LayerNorm
        ln1_g=1.0 + nrm(ks[7], (1, d_model), 0.1),
        ln1_b=nrm(ks[8], (1, d_model), 0.1),
        # PositionwiseFF
        w1=nrm(ks[9], (d_model, d_inner), 0.09),
        b1=nrm(ks[10], (1, d_inner), 0.1),
        w2=nrm(ks[11], (d_inner, d_model), 0.06),
        b2=nrm(ks[12], (1, d_model), 0.1),
        ln2_g=1.0 + nrm(ks[13], (1, d_model), 0.1),
        ln2_b=nrm(ks[14], (1, d_model), 0.1),
    )


if __name__ == "__main__":
    # Lane/tile-aligned demo config: seq=128, batch=2, d_model=128, n_head=4,
    # d_head=32 (H*Dh = 128), d_inner=256, n_layer=2; k_len = d_model >= seq.
    T, B = 128, 2
    d_model, n_head, d_head, d_inner, n_layer = 128, 4, 32, 256, 2
    k_len = d_model   # BuildEncoder: k_len = config.enc.d_model

    key = jax.random.PRNGKey(0)
    k_in, k_par = jax.random.split(key)
    inputs = jax.random.normal(k_in, (T, B, d_model), jnp.float32)   # (seq, batch, d_model)
    input_lengths = jnp.full((B,), T, jnp.int32)
    layers = [
        init_layer_params(k, k_len=k_len, n_head=n_head, d_model=d_model,
                          d_head=d_head, d_inner=d_inner)
        for k in jax.random.split(k_par, n_layer)
    ]

    # 1) In-kernel rel-shift is pure data movement: must match the reference exactly.
    m_test = jax.random.normal(jax.random.PRNGKey(1), (T, T), jnp.float32)
    shift_err = float(jnp.max(jnp.abs(
        jax.block_until_ready(rel_shift_pallas(m_test)) - _rel_shift_ref(m_test))))
    assert shift_err < 1e-6, f"rel_shift mismatch: {shift_err}"

    # 2) Production path: bf16 MXU operands, f32 accumulation, EUP reciprocal.
    out = build_encoder_forward(inputs, input_lengths, layers,
                                n_head=n_head, d_head=d_head)
    out = jax.block_until_ready(out)
    assert out.shape == (T, B, d_model)
    assert bool(jnp.all(jnp.isfinite(out)))

    # 3) Numerics vs a pure-JAX HIGHEST-precision reference of the module.
    out_f32 = build_encoder_forward(inputs, input_lengths, layers,
                                    n_head=n_head, d_head=d_head,
                                    compute_dtype=jnp.float32, approx_recip=False)
    ref = jnp.transpose(
        _layer_reference(jnp.transpose(inputs, (1, 0, 2)), layers[-1],
                         n_head=n_head, d_head=d_head), (1, 0, 2))

    def rel_err(a, b):
        return float(jnp.linalg.norm((a - b).ravel()) /
                     (jnp.linalg.norm(b.ravel()) + 1e-12))

    err_f32 = rel_err(out_f32, ref)
    err_bf16 = rel_err(out, ref)
    assert err_f32 < 5e-2, f"f32 kernel mismatch vs reference: {err_f32}"
    assert err_bf16 < 1e-1, f"bf16 kernel mismatch vs reference: {err_bf16}"
    print("KERNEL_OK")
</pallas_src>

<mosaic_0001>
module attributes {stable_mosaic.version = 11 : i64} {
  func.func @kern(%arg0: memref<8x128xf32, #tpu.memory_space<vmem>>, %arg1: memref<8x128xf32, #tpu.memory_space<vmem>>) attributes {dimension_semantics = [], scalar_prefetch = 0 : i64, scratch_operands = 0 : i64, tpu.core_type = #tpu.core_type<tc>} {
    %c0 = arith.constant 0 : index
    %c0_0 = arith.constant 0 : index
    %0 = vector.load %arg0[%c0, %c0_0] : memref<8x128xf32, #tpu.memory_space<vmem>>, vector<8x128xf32>
    %c1_i32 = arith.constant 1 : i32
    %1 = tpu.dynamic_rotate %0 by %c1_i32 dim 1 : vector<8x128xf32>, i32 -> vector<8x128xf32>
    %c0_1 = arith.constant 0 : index
    %c0_2 = arith.constant 0 : index
    %2 = vector.load %arg1[%c0_1, %c0_2] : memref<8x128xf32, #tpu.memory_space<vmem>>, vector<8x128xf32>
    tpu.vector_store %arg1[%c0_1, %c0_2], %1 {strides = array<i32>} : memref<8x128xf32, #tpu.memory_space<vmem>>, vector<8x128xf32>,
    return
  }
}

</mosaic_0001>

<bundles_post_ra>
// kernel: tpu_custom_call.1
= control target key start
LH: loop header
LB: loop body
LE: loop exit
PB: predicated region body
PF: predicated region fallthrough
CT: control target
= control target key end

     0   :  { %6 = vsyncpa [#allocation3], 0  ;;  %s128_s0 = inlined_call_operand.hbm [shape: f32[8,128], index: 0, kind: input, shape index: {}]   ;;  %s129_s1 = inlined_call_operand.hbm [shape: f32[8,128], index: 1, kind: output, shape index: {}]  }
   0x1   :  { %7 = vsyncpa [#allocation4], 0  ;;  %s91_s6 = smov [#allocation2]   ;;  %s43_s10 = scalar_lea.hbm %s128_s0, 128 }
   0x2   :  { %s14_s7 = sshll.u32 %s91_s6, 4  ;;  %p44_p0 = scmp.ne.s32.totalorder %s128_s0, %s43_s10  ;;  %s15_s7 = int_to_ptr.vmem [resolvable:$true] %s14_s7 }
   0x3   :  { %p47_p1 = scmp.lt.u32.totalorder %s43_s10, %s128_s0 }
   0x5   :  { %p49_p2 = pnand %p47_p1, %p44_p0 }
   0x7   :  { %52 = shalt.err (!%p49_p2)
}
   0x8   :  { %s53_s15 = scalar_lea.vmem %s15_s7, 128  ;;  %p58_p4 = scmp.lt.s32.totalorder %s15_s7, %s15_s7 }
   0x9   :  { %p54_p3 = scmp.ne.s32.totalorder %s15_s7, %s53_s15  ;;  %p59_p5 = scmp.lt.s32.totalorder %s53_s15, %s53_s15 }
   0xb   :  { %p60_p6 = por %p59_p5, %p58_p4 }
   0xd   :  { %p61_p7 = pnand %p60_p6, %p54_p3 }
   0xf   :  { %64 = shalt.err (!%p61_p7)
}
  0x10   :  { %17 = dma.hbm_to_vmem [thread:$0]  %s128_s0, 128, %s15_s7, [#allocation3]  }
  0x11   :  { %87 = dma.done.wait [#allocation3], 128  }
  0x12   :  { %88 = vsyncadd [#allocation3], 4294967168  ;;  %v21_v0 = vld [vmem:[#allocation2] sm:$0xff]  ;;  %s92_s18 = smov 1   ;;  %s93_s19 = smov [#allocation5]  }
  0x13   :  { %22 = vrot.lane.b32.xlu0 %v21_v0, %s92_s18  ;;  %s31_s20 = sshll.u32 %s93_s19, 4  ;;  %s32_s20 = int_to_ptr.vmem [resolvable:$true] %s31_s20 }
  0x14   :  { %s65_s21 = scalar_lea.vmem %s32_s20, 128  ;;  %p70_p9 = scmp.lt.s32.totalorder %s32_s20, %s32_s20 }
  0x15   :  { %p66_p8 = scmp.ne.s32.totalorder %s32_s20, %s65_s21  ;;  %p71_p10 = scmp.lt.s32.totalorder %s65_s21, %s65_s21 }
  0x17   :  { %p72_p11 = por %p71_p10, %p70_p9 }
  0x19   :  { %p73_p12 = pnand %p72_p11, %p66_p8 }
  0x85   :  { %v23_v1 = vpop.permute.xlu0 %22 }
  0x86   :  { %24 = vst [vmem:[#allocation5] sm:$0xff] %v23_v1 }
  0x87   :  { %76 = shalt.err (!%p73_p12)
}
  0x88   :  { %s77_s0 = scalar_lea.hbm %s129_s1, 128 }
  0x89   :  { %p78_p13 = scmp.ne.s32.totalorder %s129_s1, %s77_s0  ;;  %p81_p0 = scmp.lt.u32.totalorder %s77_s0, %s129_s1 }
  0x8b   :  { %p83_p1 = pnand %p81_p0, %p78_p13 }
  0x8d   :  { %86 = shalt.err (!%p83_p1)
}
  0x8e   :  { %34 = dma.vmem_to_hbm [thread:$0]  %s32_s20, 128, %s129_s1, [#allocation4]  }
  0x8f   :  { %89 = dma.done.wait [#allocation4], 128  }
  0x90   :  { %90 = vsyncadd [#allocation4], 4294967168 }
  0x91   :  { %38 = vsyncpa [#allocation3], 1 }
  0x92   :  { %39 = vsyncpa [#allocation4], 1 }

</bundles_post_ra>
